<compile_context>
chip_gen: v7x
topology: tpu7x:2x2x1
jax: 0.10.0
libtpu: 0.0.40
codegen_flags: <defaults>
</compile_context>

<pallas_src>
import numpy as np
import jax
import jax.numpy as jnp
from jax.experimental import pallas as pl
from jax.experimental.pallas import tpu as pltpu


def _make_kernel(d_min, d_max, n_c):
    # discrete2continuous(t) = exp(t * scale + offset)
    scale = float(np.log(d_max / d_min) / (n_c - 1))
    offset = float(np.log(d_min))
    k = float(np.exp(scale))          # ratio d(t+1) / d(t), compile-time const
    c_lo = 0.5 * (1.0 + k)            # depth_low  = d(t) * c_lo
    c_fr = k - 1.0                    # depth = d(t) * c_lo * (1 + c_fr * frac)

    def kernel(x_ref, o_ref):
        # x_ref block: (1, 2C, T).  PyTorch decode_ord pairs channels as
        # (c, 2): logit-0 in row 2c, logit-1 in row 2c+1.
        xb = x_ref[0].astype(jnp.float32)            # (2C, T)

        # Pairwise "next minus current" via contiguous sublane slices.
        # Row 2c of `diff` is y1[c] - y0[c]; odd rows are junk and get masked.
        diff = xb[1:, :] - xb[:-1, :]                # (2C-1, T)

        # decode_ord: P(bit=1) = sigmoid(y1 - y0).  Stable: exp never NaNs on
        # finite input, and overflow/underflow saturate to the correct 0/1.
        sig = 1.0 / (1.0 + jnp.exp(-diff))           # (2C-1, T)

        # Keep only even rows (the real class probabilities), sum over classes.
        row = jax.lax.broadcasted_iota(jnp.int32, sig.shape, 0)
        masked = jnp.where((row & 1) == 0, sig, 0.0)
        prob_sum = jnp.sum(masked, axis=0, keepdims=True)   # (1, T)

        # soft_ordinal_regression
        integral = jnp.floor(prob_sum)
        fraction = prob_sum - integral
        d0 = jnp.exp(integral * scale + offset)      # discrete2continuous(I)
        # depth_low  = d0*(1+k)/2, depth_high = d0*k*(1+k)/2
        # depth = lo*(1-f) + hi*f = d0 * c_lo * (1 + (k-1)*f)
        o_ref[0] = (d0 * (c_lo * (1.0 + c_fr * fraction))).astype(o_ref.dtype)

    return kernel


def _tpu_vmem_capacity_bytes():
    """Physical VMEM per TensorCore; conservative (v7x) default if unknown."""
    try:
        return int(pltpu.get_tpu_info().vmem_capacity_bytes)
    except Exception:
        return 64 << 20


def _pick_lane_tile(hw, rows, elem_bytes, batch, max_block_bytes):
    """Largest 128-multiple lane tile whose input block fits max_block_bytes,
    kept megacore-friendly (>= 2 total grid steps when batch == 1)."""
    if hw <= 128:
        return hw                                     # full extent (legal)
    t_budget = max(128, (max_block_bytes // (rows * elem_bytes)) // 128 * 128)
    t = hw if t_budget >= hw else t_budget
    if batch * pl.cdiv(hw, t) < 2:                    # keep both v7x TCs busy
        half = (((hw + 1) // 2) + 127) // 128 * 128
        if 128 <= half < hw:
            t = half
    return t


def base_classification_forward(x, *, min_depth, max_depth, num_classes,
                                max_block_bytes=None):
    """x: (B, 2*num_classes, H, W) logits -> (B, 1, H, W) depth."""
    B, P, H, W = x.shape
    assert P == 2 * num_classes
    HW = H * W

    # Contiguous (free) reshape only -- no strided de-interleave in HBM.
    x3 = x.reshape(B, P, HW)
    elem = x3.dtype.itemsize

    vmem_cap = _tpu_vmem_capacity_bytes()
    if max_block_bytes is None:
        # Double-buffered input stays <= vmem_cap/4; cap blocks at 24 MiB.
        max_block_bytes = max(4 << 20, min(vmem_cap // 8, 24 << 20))

    T = _pick_lane_tile(HW, P, elem, B, max_block_bytes)
    n_t = pl.cdiv(HW, T)

    in_block_bytes = P * T * elem
    out_block_bytes = T * 4
    vmem_limit = 2 * in_block_bytes + 2 * out_block_bytes + (8 << 20)
    vmem_limit = max(vmem_limit, 32 << 20)
    vmem_limit = min(vmem_limit, (96 << 20) if vmem_cap >= (100 << 20)
                     else (48 << 20))

    kernel = _make_kernel(min_depth, max_depth, num_classes)

    cost = pl.CostEstimate(
        flops=int(B * HW * (6 * num_classes + 10)),
        transcendentals=int(B * HW * (2 * num_classes + 1)),
        bytes_accessed=int(B * (P * HW * elem + HW * 4)),
    )

    out = pl.pallas_call(
        kernel,
        out_shape=jax.ShapeDtypeStruct((B, 1, HW), jnp.float32),
        grid_spec=pltpu.PrefetchScalarGridSpec(
            num_scalar_prefetch=0,
            grid=(B, n_t),
            in_specs=[pl.BlockSpec((1, P, T), lambda b, t: (b, 0, t))],
            out_specs=pl.BlockSpec((1, 1, T), lambda b, t: (b, 0, t)),
        ),
        compiler_params=pltpu.CompilerParams(
            dimension_semantics=("parallel", "parallel"),
            vmem_limit_bytes=int(vmem_limit),
        ),
        cost_estimate=cost,
    )(x3)

    return out.reshape(B, 1, H, W)


def _reference(x, min_depth, max_depth, num_classes):
    """Pure-JAX reference mirroring the PyTorch code (naive softmax form)."""
    B, P, H, W = x.shape
    y = x.reshape(B, P // 2, 2, H, W).astype(jnp.float32)
    denom = jnp.sum(jnp.exp(y), axis=2)
    pred_prob = jnp.exp(y[:, :, 1, :, :]) / denom
    prob_sum = jnp.sum(pred_prob, axis=1, keepdims=True)
    integral = jnp.floor(prob_sum)
    fraction = prob_sum - integral

    def d2c(t):
        return jnp.exp(t / (num_classes - 1) * np.log(max_depth / min_depth)
                       + np.log(min_depth))

    lo = (d2c(integral) + d2c(integral + 1)) / 2
    hi = (d2c(integral + 1) + d2c(integral + 2)) / 2
    return lo * (1 - fraction) + hi * fraction


if __name__ == "__main__":
    # Module config (this module has no learnable parameters).
    min_depth = 0.5
    max_depth = 10.0
    num_classes = 8

    B, H, W = 2, 16, 16
    key = jax.random.PRNGKey(0)
    x = jax.random.normal(key, (B, 2 * num_classes, H, W), dtype=jnp.float32)

    out = base_classification_forward(
        x, min_depth=min_depth, max_depth=max_depth, num_classes=num_classes)
    out = jax.block_until_ready(out)

    ref = _reference(x, min_depth, max_depth, num_classes)
    assert out.shape == (B, 1, H, W)
    np.testing.assert_allclose(np.asarray(out), np.asarray(ref),
                               rtol=1e-5, atol=1e-5)
    print("KERNEL_OK")
</pallas_src>

<mosaic_0001>
module attributes {stable_mosaic.version = 11 : i64} {
  func.func @kernel(%arg0: i32, %arg1: i32, %arg2: memref<1x16x256xf32, #tpu.memory_space<vmem>>, %arg3: memref<1x1x256xf32, #tpu.memory_space<vmem>>) attributes {dimension_semantics = [#tpu.dimension_semantics<parallel>, #tpu.dimension_semantics<parallel>], iteration_bounds = array<i64: 2, 1>, scalar_prefetch = 0 : i64, scratch_operands = 0 : i64, tpu.core_type = #tpu.core_type<tc>, window_params = [{transform_indices = @transform_0, window_bounds = array<i64: 1, 16, 256>}, {transform_indices = @transform_1, window_bounds = array<i64: 1, 1, 256>}]} {
    %c0 = arith.constant 0 : index
    %c0_0 = arith.constant 0 : index
    %c0_1 = arith.constant 0 : index
    %0 = vector.load %arg2[%c0, %c0_0, %c0_1] : memref<1x16x256xf32, #tpu.memory_space<vmem>>, vector<1x16x256xf32>
    %1 = vector.shape_cast %0 : vector<1x16x256xf32> to vector<16x256xf32>
    %2 = vector.extract_strided_slice %1 {offsets = [1, 0], sizes = [15, 256], strides = [1, 1]} : vector<16x256xf32> to vector<15x256xf32>
    %3 = vector.extract_strided_slice %1 {offsets = [0, 0], sizes = [15, 256], strides = [1, 1]} : vector<16x256xf32> to vector<15x256xf32>
    %4 = arith.subf %2, %3 : vector<15x256xf32>
    %cst = arith.constant 0.000000e+00 : f32
    %5 = vector.broadcast %cst : f32 to vector<15x256xf32>
    %6 = arith.subf %5, %4 : vector<15x256xf32>
    %7 = math.exp %6 : vector<15x256xf32>
    %cst_2 = arith.constant 1.000000e+00 : f32
    %8 = vector.broadcast %cst_2 : f32 to vector<15x256xf32>
    %9 = arith.addf %8, %7 : vector<15x256xf32>
    %cst_3 = arith.constant 1.000000e+00 : f32
    %10 = vector.broadcast %cst_3 : f32 to vector<15x256xf32>
    %11 = arith.divf %10, %9 : vector<15x256xf32>
    %12 = tpu.iota {dimensions = array<i32: 0>} : vector<15x256xi32>
    %c1_i32 = arith.constant 1 : i32
    %13 = vector.broadcast %c1_i32 : i32 to vector<15x256xi32>
    %14 = arith.andi %12, %13 : vector<15x256xi32>
    %c0_i32 = arith.constant 0 : i32
    %15 = vector.broadcast %c0_i32 : i32 to vector<15x256xi32>
    %16 = arith.cmpi eq, %14, %15 : vector<15x256xi32>
    %cst_4 = arith.constant 0.000000e+00 : f32
    %17 = vector.broadcast %cst_4 : f32 to vector<15x256xf32>
    %18 = arith.select %16, %11, %17 : vector<15x256xi1>, vector<15x256xf32>
    %cst_5 = arith.constant dense<0.000000e+00> : vector<256xf32>
    %19 = vector.multi_reduction <add>, %18, %cst_5 [0] : vector<15x256xf32> to vector<256xf32>
    %20 = vector.shape_cast %19 : vector<256xf32> to vector<1x256xf32>
    %21 = math.floor %20 : vector<1x256xf32>
    %22 = arith.subf %20, %21 : vector<1x256xf32>
    %cst_6 = arith.constant 0.427961767 : f32
    %23 = vector.broadcast %cst_6 : f32 to vector<1x256xf32>
    %24 = arith.mulf %21, %23 : vector<1x256xf32>
    %cst_7 = arith.constant -0.693147182 : f32
    %25 = vector.broadcast %cst_7 : f32 to vector<1x256xf32>
    %26 = arith.addf %24, %25 : vector<1x256xf32>
    %27 = math.exp %26 : vector<1x256xf32>
    %cst_8 = arith.constant 0.534127414 : f32
    %28 = vector.broadcast %cst_8 : f32 to vector<1x256xf32>
    %29 = arith.mulf %28, %22 : vector<1x256xf32>
    %cst_9 = arith.constant 1.000000e+00 : f32
    %30 = vector.broadcast %cst_9 : f32 to vector<1x256xf32>
    %31 = arith.addf %30, %29 : vector<1x256xf32>
    %cst_10 = arith.constant 1.26706374 : f32
    %32 = vector.broadcast %cst_10 : f32 to vector<1x256xf32>
    %33 = arith.mulf %32, %31 : vector<1x256xf32>
    %34 = arith.mulf %27, %33 : vector<1x256xf32>
    %c0_11 = arith.constant 0 : index
    %c0_12 = arith.constant 0 : index
    %c0_13 = arith.constant 0 : index
    %35 = vector.load %arg3[%c0_11, %c0_12, %c0_13] : memref<1x1x256xf32, #tpu.memory_space<vmem>>, vector<1x1x256xf32>
    %36 = vector.shape_cast %35 : vector<1x1x256xf32> to vector<1x256xf32>
    %37 = vector.shape_cast %34 : vector<1x256xf32> to vector<1x1x256xf32>
    tpu.vector_store %arg3[%c0_11, %c0_12, %c0_13], %37 {strides = array<i32>} : memref<1x1x256xf32, #tpu.memory_space<vmem>>, vector<1x1x256xf32>,
    return
  }
  func.func @transform_0(%arg0: i32, %arg1: i32) -> (i32, i32, i32) {
    %c0_i32 = arith.constant 0 : i32
    %c0_i32_0 = arith.constant 0 : i32
    return %arg0, %c0_i32, %arg1 : i32, i32, i32
  }
  func.func @transform_1(%arg0: i32, %arg1: i32) -> (i32, i32, i32) {
    %c0_i32 = arith.constant 0 : i32
    %c0_i32_0 = arith.constant 0 : i32
    return %arg0, %c0_i32, %arg1 : i32, i32, i32
  }
}

</mosaic_0001>

<bundles_post_ra>
// kernel: tpu_custom_call.1
= control target key start
LH: loop header
LB: loop body
LE: loop exit
PB: predicated region body
PF: predicated region fallthrough
CT: control target
= control target key end

     0   :  { %6 = vsyncpa [#allocation3], 0  ;;  %s800_s0 = inlined_call_operand.hbm [shape: f32[2,16,256], index: 0, kind: input, shape index: {}]   ;;  %s801_s1 = inlined_call_operand.hbm [shape: f32[2,1,256], index: 1, kind: output, shape index: {}]  }
   0x1   :  { %8 = vsyncpa [#allocation3 + $0x1], 0 }
   0x2   :  { %9 = vsyncpa [#allocation4], 0 }
   0x3   :  { %11 = vsyncpa [#allocation4 + $0x1], 0  ;;  %s619_s6 = smov 0   ;;  %s621_s7 = smov 0  }
   0x4   :  { %s623_s8 = smov 0   ;;  %s625_s9 = smov 0  }
   0x5   :  { %s627_s10 = smov 0   ;;  %s629_s11 = smov 0  }
   0x6 LB: > { %s388_s12 = sadd.s32 4294967295, %s602_s11   ;;  %s389_s13 = sadd.s32 4294967294, %s602_s11   ;;  %s602_s11 = sphi %s629_s11, %s17_s11   ;;  %s598_s10 = sphi %s627_s10, %s816_s10   ;;  %s594_s9 = sphi %s625_s9, %s815_s9   ;;  %s590_s8 = sphi %s623_s8, %s814_s8   ;;  %s586_s7 = sphi %s621_s7, %s813_s7   ;;  %s582_s6 = sphi %s619_s6, %s812_s6  }
   0x7   : > { %s29_s14 = sadd.s32 1, %s598_s10  ;;  %s38_s15 = sadd.s32 1, %s590_s8 }
   0x8   : > { %p31_p0 = scmp.ge.s32.totalorder %s29_s14, 2  ;;  %p45_p1 = scmp.ne.s32.totalorder %s590_s8, %s586_s7 }
   0x9   : > { %p46_p2 = scmp.eq.s32.totalorder %s602_s11, 0  ;;  %p51_p3 = scmp.ne.s32.totalorder %s586_s7, %s582_s6 }
   0xa   : > { %s818_s14 = smov (%p31_p0, %s29_s14), 0  ;;  %p52_p5 = scmp.eq.s32.totalorder %s388_s12, 0 }
   0xb   : > { %p660_p4 = por %p46_p2, %p45_p1  ;;  %s33_s17 = ssub.s32 %s598_s10, %s818_s14 }
   0xc   : > { %p77_p6 = scmp.eq.s32.totalorder %s388_s12, 1  ;;  %p36_p7 = scmp.eq.s32.totalorder %s33_s17, 0 }
   0xd   : > { %p666_p8 = por %p52_p5, %p51_p3  ;;  %p83_p10 = scmp.eq.s32.totalorder %s389_s13, 1 }
   0xe   : > { %p670_p9 = por %p77_p6, %p45_p1  ;;  %p417_p13 = scmp.lt.s32.totalorder %s602_s11, 2 }
   0xf   : > { %s675_s20 = scalar_select %p36_p7, %s590_s8, %s38_s15  }
  0x10   : > { %s805_s19 = scalar_select %p670_p9, 1, 0 }
  0x11   : > { %p677_p11 = por %p83_p10, %p51_p3  ;;  %s103_s22 = sand.u32 1, %s590_s8  }
  0x12   : > { %s392_s23 = sshll.u32 %s103_s22, 5  ;;  %s403_s24 = sshll.u32 %s598_s10, 9 }
  0x13   : > { %s806_s21 = scalar_select %p677_p11, 1, 0 }
  0x14   : > { %s688_s27 = scalar_lea.hbm %s800_s0, %s403_s24  ;;  %s107_s28 = scalar_lea.vmem [#allocation2], %s392_s23 }
  0x15   : > { %s116_s29 = sshll.u32 %s107_s28, 4  ;;  %p694_p0 = pnand %p417_p13, %p660_p4  ;;  %s690_s29 = int_to_ptr.vmem [resolvable:$true] %s116_s29 }
  0x16   : > { %s699_s2 = scalar_lea.sflag [#allocation3], %s103_s22  ;;  %s490_s3 = scalar_lea.hbm %s688_s27, 512 }
  0x17   : > { %p491_p2 = scmp.ne.s32.totalorder %s688_s27, %s490_s3  ;;  %p492_p3 = pneg %p694_p0 }
  0x18   : > { %s495_s12 = scalar_lea.hbm %s800_s0, 1024  ;;  %p496_p4 = scmp.lt.u32.totalorder %s688_s27, %s800_s0 }
  0x19   : > { %p493_p5 = pnand %p492_p3, %p491_p2  ;;  %p497_p7 = scmp.lt.u32.totalorder %s495_s12, %s490_s3 }
  0x1a   : > { %p499_p13 = scmp.lt.u32.totalorder %s490_s3, %s688_s27 }
  0x1b   : > { %p494_p6 = pneg %p493_p5  ;;  %p498_p10 = por %p497_p7, %p496_p4 }
  0x1d   : > { %p500_p12 = por %p499_p13, %p498_p10 }
  0x1f   : > { %p501_p1 = pnand %p500_p12, %p494_p6 }
  0x21   : > { %504 = shalt.err (!%p501_p1)
}
  0x22   : > { %s505_s16 = scalar_lea.vmem %s690_s29, 512  ;;  %s604_s17 = smov [#allocation2]  }
  0x23   : > { %p506_p2 = scmp.ne.s32.totalorder %s690_s29, %s505_s16  ;;  %s510_s22 = sshll.u32 %s604_s17, 4  ;;  %s511_s22 = int_to_ptr.vmem [resolvable:$false] %s510_s22 }
  0x24   : > { %s512_s23 = scalar_lea.vmem %s511_s22, 1024  ;;  %p513_p9 = scmp.lt.s32.totalorder %s690_s29, %s511_s22 }
  0x25   : > { %p508_p5 = pnand %p506_p2, %p492_p3  ;;  %p514_p4 = scmp.lt.s32.totalorder %s512_s23, %s505_s16 }
  0x27   : > { %p509_p11 = pneg %p508_p5  ;;  %p515_p7 = por %p514_p4, %p513_p9 }
  0x29   : > { %p516_p10 = pnand %p515_p7, %p509_p11 }
  0x2b   : > { %519 = shalt.err (!%p516_p10)
}
  0x2c   : > { %s605_s24 = smov 256   ;;  %s606_s25 = smov 16  }
  0x2d   : > { %412 = dma.hbm_to_vmem [thread:$0]  (!%p694_p0), %s688_s27, 512, %s690_s29, %s699_s2, %s605_s24, %s605_s24, %s606_s25  }
  0x2e   : > { %p124_p12 = scmp.lt.s32.totalorder %s602_s11, 3  ;;  %p808_p1 = scmp.ge.s32.totalorder %s602_s11, 1 }
  0x30   : > { %p125_p3 = pnand %p808_p1, %p124_p12 }
  0x31   : > { %s731_s26 = sand.u32 (!%p125_p3), 1, %s586_s7  }
  0x32   : > { %128 = sbr.rel (%p125_p3) target bundleno = 153 (0x99), region = 24  ;;  %s396_s28 = sshll.u32 (!%p125_p3), %s731_s26, 5 }
  0x33   : > { %s131_s3 = scalar_lea.sflag (!%p125_p3), [#allocation3], %s731_s26  ;;  %s134_s4 = scalar_lea.vmem (!%p125_p3), [#allocation2], %s396_s28 }
  0x39   : > { %573 = dma.done.wait (%p666_p8), %s131_s3, 512  }
  0x3a   : > { %575 = vsyncadd (%p666_p8), %s131_s3, 4294966784  ;;  %v155_v0 = vld [vmem:[%s134_s4] sm:$0xff]  ;;  %v156_v1 = vld [vmem:[%s134_s4 + $0x8] sm:$0xff]  ;;  %vm163_vm0 = vcmask 1040384   ;;  %v202_v22 = vlaneseq  ;;  %vm213_vm2 = vcmask 1046528   ;;  %s397_s18 = sshll.u32 %s731_s26, 1 }
  0x3b   : > { %v157_v2 = vld [vmem:[%s134_s4 + $0x10] sm:$0xff]  ;;  %v158_v3 = vld [vmem:[%s134_s4 + $0x18] sm:$0xff]  ;;  %v164_v4 = vrot.slane %v155_v0, 7  ;;  %v165_v5 = vrot.slane %v156_v1, 7  ;;  %s152_s27 = scalar_lea.vmem [#allocation5], %s397_s18  ;;  %s404_s30 = sshll.u32 %s594_s9, 5 }
  0x3c   : > { %v166_v6 = vrot.slane %v157_v2, 7  ;;  %v168_v7 = vrot.slane %v158_v3, 7  ;;  %v740_v30 = vshrl.u32 %v202_v22, 7  ;;  %s304_s29 = sshll.u32 %s152_s27, 4  ;;  %vm284_vm4 = vcmp.lt.s32.totalorder %v202_v22, 256  ;;  %s753_s12 = scalar_lea.hbm %s801_s1, %s404_s30  ;;  %s748_s29 = int_to_ptr.vmem [resolvable:$true] %s304_s29 }
  0x3d   : > { %v174_v9 = vsub.f32 %v155_v0, %v164_v4  ;;  %v175_v10 = vsub.f32 %v156_v1, %v165_v5  ;;  %s288_s13 = scalar_lea.sflag [#allocation4], %s731_s26  ;;  %s520_s15 = scalar_lea.vmem %s748_s29, 32 }
  0x3e   : > { %v167_v8 = vsel %vm163_vm0, %v164_v4, %v166_v6  ;;  %v169_v11 = vsel %vm163_vm0, %v165_v5, %v168_v7  ;;  %v204_v32 = vadd.s32 8, %v740_v30  ;;  %v205_v34 = vand.u32 1, %v740_v30  ;;  %p521_p8 = scmp.ne.s32.totalorder %s748_s29, %s520_s15  ;;  %p809_p9 = scmp.ne.s32.totalorder %s805_s19, 0 }
  0x3f   : > { %v176_v12 = vsub.f32 %v157_v2, %v167_v8  ;;  %v177_v13 = vsub.f32 %v158_v3, %v169_v11  ;;  %v178_v14 = vsub.f32 0.0, %v174_v9  ;;  %v179_v15 = vsub.f32 0.0, %v175_v10  ;;  %s608_s9 = smov [#allocation5]  }
  0x40   : > { %v206_v33 = vand.u32 1, %v204_v32  ;;  %vm207_vm3 = vcmp.eq.s32.totalorder %v205_v34, 0  ;;  %p522_p11 = pnand %p521_p8, %p809_p9  ;;  %s524_s16 = sshll.u32 %s608_s9, 4  ;;  %s525_s16 = int_to_ptr.vmem [resolvable:$false] %s524_s16 }
  0x41   : > { %v180_v16 = vsub.f32 0.0, %v176_v12  ;;  %v181_v17 = vsub.f32 0.0, %v177_v13  ;;  %v182_v18 = vmul.f32 1.442695, %v178_v14  ;;  %v184_v19 = vmul.f32 1.442695, %v179_v15  ;;  %p527_p6 = scmp.lt.s32.totalorder %s748_s29, %s525_s16 }
  0x42   : > { %vm208_vm1 = vcmp.eq.s32.totalorder %v206_v33, 0  ;;  %v607_v15 = vmov 1966171168   ;;  %p523_p0 = pneg %p522_p11  ;;  %s526_s17 = scalar_lea.vmem %s525_s16, 64 }
  0x43   : > { %v186_v20 = vmul.f32 1.442695, %v180_v16  ;;  %470 = vpow2.f32 %v182_v18  ;;  %v188_v21 = vmul.f32 1.442695, %v181_v17  ;;  %v268_v16 = vunpack.c.l.s4 %v607_v15  ;;  %p528_p13 = scmp.lt.s32.totalorder %s526_s17, %s520_s15 }
  0x44   : > { %472 = vpow2.f32 %v184_v19 }
  0x45   : > { %474 = vpow2.f32 %v186_v20  ;;  %v269_v19 = vunpack.c.0.s8 %v268_v16  ;;  %p529_p2 = por %p528_p13, %p527_p6 }
  0x46   : > { %476 = vpow2.f32 %v188_v21 }
  0x47   : > { %p530_p5 = pnand %p529_p2, %p523_p0 }
  0x4d   : > { %v471_v23 = vpop.eup %470 }
  0x4e   : > { %v473_v24 = vpop.eup %472  ;;  %v190_v25 = vadd.f32 1.0, %v471_v23 }
  0x4f   : > { %v475_v26 = vpop.eup %474  ;;  %v191_v27 = vadd.f32 1.0, %v473_v24 }
  0x50   : > { %v477_v28 = vpop.eup %476  ;;  %v192_v29 = vadd.f32 1.0, %v475_v26  ;;  %478 = vrcp.f32 %v190_v25  ;;  %v272_v25 = vsub.s32 %v269_v19, %v740_v30 }
  0x51   : > { %v193_v31 = vadd.f32 1.0, %v477_v28  ;;  %480 = vrcp.f32 %v191_v27 }
  0x52   : > { %482 = vrcp.f32 %v192_v29 }
  0x53   : > { %484 = vrcp.f32 %v193_v31 }
  0x5a   : > { %v479_v35 = vpop.eup %478 }
  0x5b   : > { %v481_v36 = vpop.eup %480  ;;  %v214_v37 = vrot.slane %v479_v35, 1 }
  0x5c   : > { %v483_v38 = vpop.eup %482  ;;  %v217_v39 = vrot.slane %v481_v36, 1 }
  0x5d   : > { %v485_v40 = vpop.eup %484  ;;  %v215_v41 = vrot.slane %v483_v38, 1 }
  0x5e   : > { %v218_v42 = vrot.slane %v485_v40, 1 }
  0x5f   : > { %v216_v43 = vsel %vm213_vm2, %v214_v37, %v215_v41  ;;  %v226_v44 = vsel %vm208_vm1, %v215_v41, 0.0 }
  0x60   : > { %v219_v45 = vsel %vm213_vm2, %v217_v39, %v218_v42  ;;  %v224_v46 = vsel %vm207_vm3, %v216_v43, 0.0  ;;  %v227_v47 = vsel %vm208_vm1, %v218_v42, 0.0  ;;  %v228_v48 = vsel %vm213_vm2, %v226_v44, 0.0 }
  0x61   : > { %v225_v49 = vsel %vm207_vm3, %v219_v45, 0.0  ;;  %v229_v50 = vadd.f32 %v228_v48, %v224_v46  ;;  %v236_v51 = vsel %vm213_vm2, %v227_v47, 0.0 }
  0x62   : > { %v237_v52 = vadd.f32 %v236_v51, %v225_v49 }
  0x63   : > { %v230_v53 = vrot.slane %v229_v50, 4 }
  0x64   : > { %v238_v54 = vrot.slane %v237_v52, 4 }
  0x65   : > { %v231_v55 = vadd.f32 %v230_v53, %v229_v50 }
  0x66   : > { %v239_v56 = vadd.f32 %v238_v54, %v237_v52 }
  0x67   : > { %v232_v57 = vrot.slane %v231_v55, 2 }
  0x68   : > { %v240_v58 = vrot.slane %v239_v56, 2 }
  0x69   : > { %v233_v59 = vadd.f32 %v232_v57, %v231_v55 }
  0x6a   : > { %v241_v60 = vadd.f32 %v240_v58, %v239_v56 }
  0x6b   : > { %v234_v61 = vrot.slane %v233_v59, 1 }
  0x6c   : > { %v242_v62 = vrot.slane %v241_v60, 1 }
  0x6d   : > { %v235_v63 = vadd.f32 %v234_v61, %v233_v59 }
  0x6e   : > { %v243_v0 = vadd.f32 %v242_v62, %v241_v60 }
  0x6f   : > { %v244_v1 = vfloor.f32 %v235_v63 }
  0x70   : > { %v245_v2 = vfloor.f32 %v243_v0 }
  0x71   : > { %v248_v3 = vmul.f32 0.42796177, %v244_v1  ;;  %v246_v4 = vsub.f32 %v235_v63, %v244_v1 }
  0x72   : > { %v249_v5 = vmul.f32 0.42796177, %v245_v2  ;;  %v247_v6 = vsub.f32 %v243_v0, %v245_v2 }
  0x73   : > { %v250_v7 = vadd.f32 -0.6931472, %v248_v3  ;;  %v256_v11 = vmul.f32 0.5341274, %v246_v4 }
  0x74   : > { %v251_v8 = vadd.f32 -0.6931472, %v249_v5  ;;  %v257_v12 = vmul.f32 0.5341274, %v247_v6 }
  0x75   : > { %v252_v9 = vmul.f32 1.442695, %v250_v7  ;;  %v258_v13 = vadd.f32 1.0, %v256_v11 }
  0x76   : > { %v254_v10 = vmul.f32 1.442695, %v251_v8  ;;  %v259_v14 = vadd.f32 1.0, %v257_v12 }
  0x77   : > { %486 = vpow2.f32 %v252_v9  ;;  %v260_v17 = vmul.f32 1.2670637, %v258_v13 }
  0x78   : > { %488 = vpow2.f32 %v254_v10  ;;  %v261_v18 = vmul.f32 1.2670637, %v259_v14 }
  0x81   : > { %v487_v20 = vpop.eup %486 }
  0x82   : > { %v489_v21 = vpop.eup %488  ;;  %v262_v23 = vmul.f32 %v487_v20, %v260_v17 }
  0x83   : > { %v263_v24 = vmul.f32 %v489_v21, %v261_v18 }
  0x85   : > { %v266_v26 = vcombine.low %v262_v23, %v263_v24 }
  0x87   : > { %v273_v27 = vrot.slane %v266_v26, %v272_v25 }
  0x89   : > { %v280_v28 = vrot.slane %v273_v27, %v272_v25 }
  0x8b   : > { %286 = vst.msk [vmem:[%s152_s27] sm:$0x3] %vm284_vm4, %v280_v28 }
  0x8c   : > { %533 = shalt.err (!%p530_p5)
}
  0x8d   : > { %s534_s22 = scalar_lea.hbm %s753_s12, 32  ;;  %s538_s25 = scalar_lea.hbm %s801_s1, 64 }
  0x8e   : > { %p535_p4 = scmp.ne.s32.totalorder %s753_s12, %s534_s22  ;;  %p539_p12 = scmp.lt.u32.totalorder %s753_s12, %s801_s1 }
  0x8f   : > { %p540_p1 = scmp.lt.u32.totalorder %s538_s25, %s534_s22  ;;  %p542_p8 = scmp.lt.u32.totalorder %s534_s22, %s753_s12 }
  0x90   : > { %p536_p7 = pnand %p535_p4, %p809_p9 }
  0x91   : > { %p541_p3 = por %p540_p1, %p539_p12 }
  0x92   : > { %p537_p10 = pneg %p536_p7 }
  0x93   : > { %p543_p11 = por %p542_p8, %p541_p3 }
  0x95   : > { %p544_p0 = pnand %p543_p11, %p537_p10 }
  0x97   : > { %547 = shalt.err (!%p544_p0)
}
  0x98   : > { %407 = dma.vmem_to_hbm [thread:$0]  (%p809_p9), %s748_s29, 32, %s753_s12, %s288_s13  }
  0x99 PF: > { %s316_s3 = sand.u32 1, %s582_s6   ;;  %p810_p6 = scmp.ne.s32.totalorder %s806_s21, 0 }
  0x9a   : > { %p811_p13 = scmp.ge.s32.totalorder %s602_s11, 2  ;;  %s317_s4 = scalar_lea.sflag [#allocation4], %s316_s3 }
  0x9c   : > { %p414_p2 = pnand %p811_p13, %p810_p6 }
  0x9e   : > { %577 = dma.done.wait (!%p414_p2), %s317_s4, 32  }
  0x9f   : > { %579 = vsyncadd (!%p414_p2), %s317_s4, 4294967264  ;;  %s17_s11 = sadd.s32 1, %s602_s11   ;;  %s812_s6 = smov %s586_s7 }
  0xa0   : > { %p14_p5 = scmp.ge.s32.totalorder %s17_s11, 4   ;;  %s813_s7 = smov %s590_s8 }
  0xa1   : > { %s814_s8 = smov %s675_s20  ;;  %s815_s9 = smov %s598_s10 }
  0xa2   : > { %s816_s10 = smov %s818_s14  ;;  %16 = sbr.rel (!%p14_p5) target bundleno = 6 (0x6), region = 69 }
  0xa9   :  { %322 = vsyncpa [#allocation3], 1 }
  0xaa   :  { %324 = vsyncpa [#allocation3 + $0x1], 1 }
  0xab   :  { %325 = vsyncpa [#allocation4], 1 }
  0xac   :  { %327 = vsyncpa [#allocation4 + $0x1], 1 }

</bundles_post_ra>
